<compile_context>
chip_gen: v6e
topology: v6e:2x2x1
jax: 0.10.0
libtpu: 0.0.40
codegen_flags: <defaults>
</compile_context>

<pallas_src>
import functools

import jax
import jax.numpy as jnp
from jax.experimental import pallas as pl
from jax.experimental.pallas import tpu as pltpu


# ----------------------------------------------------------------------------
# helpers
# ----------------------------------------------------------------------------
def _round_up(x, m):
    return (x + m - 1) // m * m


def _pad_axis(x, axis, mult):
    pad = (-x.shape[axis]) % mult
    if pad == 0:
        return x
    widths = [(0, 0)] * x.ndim
    widths[axis] = (0, pad)
    return jnp.pad(x, widths)


# ----------------------------------------------------------------------------
# Pallas kernel: fused audio-MLP, visual-MLP and concat-fusion linear head.
# All matmuls: bf16 operands -> f32 accumulation; epilogues (bias, GELU, ReLU)
# stay in f32.
# ----------------------------------------------------------------------------
def avclassifier_kernel(
    audio_ref, visual_ref,            # (tb, Da) / (tb, Dv) bf16 activations
    wa1_ref, ba1_ref,                 # audio encoder layer 1 (bf16 / f32)
    wv1_ref, bv1_ref,                 # visual encoder layer 1 (bf16 / f32)
    w2_ref, b2_ref,                   # block-diag [wa2|0;0|wv2] second layer
    wf_ref, bf_ref,                   # ConcatFusion weight (128, Ncls_pad)
    av_ref, out_ref,                  # outputs: [a|v] slab, padded logits
):
    f32 = jnp.float32
    bf16 = jnp.bfloat16

    # ---- audio branch (stand-in for ASTModel, label_dim=64) ----
    h_a = jnp.dot(audio_ref[...], wa1_ref[...], preferred_element_type=f32)
    h_a = jax.nn.gelu(h_a + ba1_ref[...], approximate=True)       # (tb, 128) f32

    # ---- visual branch (stand-in for manet, return_embedding=True) ----
    h_v = jnp.dot(visual_ref[...], wv1_ref[...], preferred_element_type=f32)
    h_v = jnp.maximum(h_v + bv1_ref[...], 0.0)                    # (tb, 128) f32

    # ---- second layer: one K=256 block-diagonal dot producing [a | v] ----
    # cat(h_a, h_v) @ blockdiag(wa2, wv2) == [h_a @ wa2 | h_v @ wv2]
    h = jnp.concatenate([h_a, h_v], axis=-1).astype(bf16)         # (tb, 256)
    av = jnp.dot(h, w2_ref[...], preferred_element_type=f32) + b2_ref[...]

    # ---- ConcatFusion: single K=128 dot on cat(a, v) ----
    out = jnp.dot(av.astype(bf16), wf_ref[...],
                  preferred_element_type=f32) + bf_ref[...]

    av_ref[...] = av                                              # lane-dense (tb, 128)
    out_ref[...] = out                                            # lane-dense (tb, Ncls_pad)


# ----------------------------------------------------------------------------
# parameter prep: bf16 weights, block-diagonal second layer, lane-padded head.
# ----------------------------------------------------------------------------
def prepare_kernel_params(params, n_classes):
    wa1, ba1, wa2, ba2, wv1, bv1, wv2, bv2, wf, bf = params
    hidden = wa1.shape[1]
    d_embed = wa2.shape[1]
    de2 = 2 * d_embed                                  # 128 -> one full lane tile
    bf16 = jnp.bfloat16
    f32 = jnp.float32

    # block-diagonal second-layer weight / concatenated bias
    w2 = jnp.zeros((2 * hidden, de2), f32)
    w2 = w2.at[:hidden, :d_embed].set(wa2)
    w2 = w2.at[hidden:, d_embed:].set(wv2)
    b2 = jnp.concatenate([ba2, bv2])[None, :]          # (1, 128)

    # fusion head padded to 128 output lanes (unmasked vst stores)
    ncls_p = _round_up(n_classes, 128)
    wf_p = jnp.zeros((de2, ncls_p), f32).at[:, :n_classes].set(wf)
    bf_p = jnp.zeros((1, ncls_p), f32).at[0, :n_classes].set(bf)

    # first-layer K axes padded to lane multiples (zero rows: no-op in the dot)
    wa1_p = _pad_axis(wa1, 0, 128)
    wv1_p = _pad_axis(wv1, 0, 128)

    return (wa1_p.astype(bf16), ba1[None, :].astype(f32),
            wv1_p.astype(bf16), bv1[None, :].astype(f32),
            w2.astype(bf16), b2.astype(f32),
            wf_p.astype(bf16), bf_p.astype(f32))


# ----------------------------------------------------------------------------
# forward wrapper
# ----------------------------------------------------------------------------
@functools.partial(jax.jit, static_argnames=("n_classes", "tb"))
def avclassifier_forward(audio, visual, params, n_classes, tb=8):
    """audio: (B, 1, 1, T, F); visual: (B, 3, H, W).  Returns (a, v, out)."""
    # PyTorch glue: audio.squeeze(2).expand(-1, 1, -1, -1) keeps one channel.
    audio = jnp.squeeze(audio, axis=2)                               # (B, 1, T, F)
    B = audio.shape[0]
    bf16 = jnp.bfloat16

    audio_flat = audio.reshape(B, -1).astype(bf16)                   # (B, T*F)
    visual_flat = visual.reshape(B, -1).astype(bf16)                 # (B, 3*H*W)
    audio_flat = _pad_axis(_pad_axis(audio_flat, 1, 128), 0, tb)
    visual_flat = _pad_axis(_pad_axis(visual_flat, 1, 128), 0, tb)
    Bp, Da = audio_flat.shape
    _, Dv = visual_flat.shape

    kp = prepare_kernel_params(params, n_classes)
    wa1, ba1, wv1, bv1, w2, b2, wf, bf = kp
    hidden = wa1.shape[1]
    de2 = w2.shape[1]
    ncls_p = wf.shape[1]
    d_embed = de2 // 2

    # advisory cost estimate for the XLA scheduler
    flops = 2 * Bp * (Da * hidden + Dv * hidden + 2 * hidden * de2 + de2 * ncls_p)
    bytes_accessed = (int(audio_flat.size + visual_flat.size) * 2
                      + sum(int(x.size) * x.dtype.itemsize for x in kp)
                      + Bp * (de2 + ncls_p) * 4)
    cost = pl.CostEstimate(flops=int(flops), transcendentals=int(Bp * hidden),
                           bytes_accessed=int(bytes_accessed))

    def full_spec(shape):
        # weights/biases: one resident block (constant index_map -> no re-DMA)
        return pl.BlockSpec(shape, lambda i: (0, 0))

    av, out = pl.pallas_call(
        avclassifier_kernel,
        out_shape=(
            jax.ShapeDtypeStruct((Bp, de2), jnp.float32),
            jax.ShapeDtypeStruct((Bp, ncls_p), jnp.float32),
        ),
        grid=(Bp // tb,),
        in_specs=[
            pl.BlockSpec((tb, Da), lambda i: (i, 0)),
            pl.BlockSpec((tb, Dv), lambda i: (i, 0)),
            full_spec(wa1.shape), full_spec(ba1.shape),
            full_spec(wv1.shape), full_spec(bv1.shape),
            full_spec(w2.shape), full_spec(b2.shape),
            full_spec(wf.shape), full_spec(bf.shape),
        ],
        out_specs=(
            pl.BlockSpec((tb, de2), lambda i: (i, 0)),
            pl.BlockSpec((tb, ncls_p), lambda i: (i, 0)),
        ),
        compiler_params=pltpu.CompilerParams(
            dimension_semantics=("parallel",),
            vmem_limit_bytes=32 * 1024 * 1024),
        cost_estimate=cost,
    )(audio_flat, visual_flat, *kp)

    a = av[:B, :d_embed]
    v = av[:B, d_embed:]
    logits = out[:B, :n_classes]
    return a, v, logits


# ----------------------------------------------------------------------------
# "PyTorch-equivalent" parameters (f32) and a pure-JAX reference.
# ----------------------------------------------------------------------------
def init_params(key, d_audio_in, d_visual_in, hidden, d_embed, n_classes):
    ks = jax.random.split(key, 6)
    s = 0.02
    f32 = jnp.float32
    wa1 = jax.random.normal(ks[0], (d_audio_in, hidden), f32) * s
    ba1 = jnp.zeros((hidden,), f32)
    wa2 = jax.random.normal(ks[1], (hidden, d_embed), f32) * s
    ba2 = jnp.zeros((d_embed,), f32)
    wv1 = jax.random.normal(ks[2], (d_visual_in, hidden), f32) * s
    bv1 = jnp.zeros((hidden,), f32)
    wv2 = jax.random.normal(ks[3], (hidden, d_embed), f32) * s
    bv2 = jnp.zeros((d_embed,), f32)
    # ConcatFusion fc weight on cat([a, v]) -> n_classes
    wf = jax.random.normal(ks[4], (2 * d_embed, n_classes), f32) * s
    bf = jnp.zeros((n_classes,), f32)
    return (wa1, ba1, wa2, ba2, wv1, bv1, wv2, bv2, wf, bf)


def reference_forward(audio, visual, params):
    """Pure-JAX reference with the same bf16-in / f32-acc matmul convention."""
    wa1, ba1, wa2, ba2, wv1, bv1, wv2, bv2, wf, bf = params
    bf16, f32 = jnp.bfloat16, jnp.float32
    B = audio.shape[0]
    a_in = jnp.squeeze(audio, axis=2).reshape(B, -1).astype(bf16)
    v_in = visual.reshape(B, -1).astype(bf16)
    h_a = jax.nn.gelu(
        jnp.dot(a_in, wa1.astype(bf16), preferred_element_type=f32) + ba1,
        approximate=True)
    h_v = jnp.maximum(
        jnp.dot(v_in, wv1.astype(bf16), preferred_element_type=f32) + bv1, 0.0)
    a = jnp.dot(h_a.astype(bf16), wa2.astype(bf16), preferred_element_type=f32) + ba2
    v = jnp.dot(h_v.astype(bf16), wv2.astype(bf16), preferred_element_type=f32) + bv2
    av = jnp.concatenate([a, v], axis=-1)
    out = jnp.dot(av.astype(bf16), wf.astype(bf16), preferred_element_type=f32) + bf
    return a, v, out


if __name__ == "__main__":
    key = jax.random.PRNGKey(0)
    k_a, k_v, k_p = jax.random.split(key, 3)

    B, T, F = 2, 16, 16            # audio spectrogram (small stand-in for input_tdim=256)
    H = W = 16                     # visual spatial
    hidden, d_embed, n_classes = 128, 64, 10

    audio = jax.random.normal(k_a, (B, 1, 1, T, F), jnp.float32)   # squeezed/expanded in wrapper
    visual = jax.random.normal(k_v, (B, 3, H, W), jnp.float32)     # NCHW

    params = init_params(k_p, T * F, 3 * H * W, hidden, d_embed, n_classes)

    a, v, out = avclassifier_forward(audio, visual, params, n_classes)
    jax.block_until_ready((a, v, out))

    assert a.shape == (B, d_embed)
    assert v.shape == (B, d_embed)
    assert out.shape == (B, n_classes)

    a_ref, v_ref, out_ref = reference_forward(audio, visual, params)
    assert jnp.allclose(a, a_ref, rtol=2e-2, atol=2e-2)
    assert jnp.allclose(v, v_ref, rtol=2e-2, atol=2e-2)
    assert jnp.allclose(out, out_ref, rtol=2e-2, atol=2e-2)

    print("KERNEL_OK")
</pallas_src>

<mosaic_0001>
module attributes {stable_mosaic.version = 11 : i64} {
  func.func @avclassifier_kernel(%arg0: i32, %arg1: memref<8x256xbf16, #tpu.memory_space<vmem>>, %arg2: memref<8x768xbf16, #tpu.memory_space<vmem>>, %arg3: memref<256x128xbf16, #tpu.memory_space<vmem>>, %arg4: memref<1x128xf32, #tpu.memory_space<vmem>>, %arg5: memref<768x128xbf16, #tpu.memory_space<vmem>>, %arg6: memref<1x128xf32, #tpu.memory_space<vmem>>, %arg7: memref<256x128xbf16, #tpu.memory_space<vmem>>, %arg8: memref<1x128xf32, #tpu.memory_space<vmem>>, %arg9: memref<128x128xbf16, #tpu.memory_space<vmem>>, %arg10: memref<1x128xf32, #tpu.memory_space<vmem>>, %arg11: memref<8x128xf32, #tpu.memory_space<vmem>>, %arg12: memref<8x128xf32, #tpu.memory_space<vmem>>) attributes {dimension_semantics = [#tpu.dimension_semantics<parallel>], iteration_bounds = array<i64: 1>, scalar_prefetch = 0 : i64, scratch_operands = 0 : i64, tpu.core_type = #tpu.core_type<tc>, window_params = [{transform_indices = @transform_0, window_bounds = array<i64: 8, 256>}, {transform_indices = @transform_1, window_bounds = array<i64: 8, 768>}, {pipeline_mode = #tpu.pipeline_mode<synchronous>, transform_indices = @transform_2, window_bounds = array<i64: 256, 128>}, {pipeline_mode = #tpu.pipeline_mode<synchronous>, transform_indices = @transform_3, window_bounds = array<i64: 1, 128>}, {pipeline_mode = #tpu.pipeline_mode<synchronous>, transform_indices = @transform_4, window_bounds = array<i64: 768, 128>}, {pipeline_mode = #tpu.pipeline_mode<synchronous>, transform_indices = @transform_5, window_bounds = array<i64: 1, 128>}, {pipeline_mode = #tpu.pipeline_mode<synchronous>, transform_indices = @transform_6, window_bounds = array<i64: 256, 128>}, {pipeline_mode = #tpu.pipeline_mode<synchronous>, transform_indices = @transform_7, window_bounds = array<i64: 1, 128>}, {pipeline_mode = #tpu.pipeline_mode<synchronous>, transform_indices = @transform_8, window_bounds = array<i64: 128, 128>}, {pipeline_mode = #tpu.pipeline_mode<synchronous>, transform_indices = @transform_9, window_bounds = array<i64: 1, 128>}, {transform_indices = @transform_10, window_bounds = array<i64: 8, 128>}, {transform_indices = @transform_11, window_bounds = array<i64: 8, 128>}]} {
    %c0 = arith.constant 0 : index
    %c0_0 = arith.constant 0 : index
    %0 = vector.load %arg1[%c0, %c0_0] : memref<8x256xbf16, #tpu.memory_space<vmem>>, vector<8x256xbf16>
    %c0_1 = arith.constant 0 : index
    %c0_2 = arith.constant 0 : index
    %1 = vector.load %arg3[%c0_1, %c0_2] : memref<256x128xbf16, #tpu.memory_space<vmem>>, vector<256x128xbf16>
    %cst = arith.constant dense<0.000000e+00> : vector<8x128xf32>
    %2 = tpu.matmul %0, %1, %cst {dimension_numbers = #tpu.dot_dimension_numbers<[1], [0], [0], [1], [0, 0, 1, 1], [], []>} : vector<8x256xbf16>, vector<256x128xbf16>, vector<8x128xf32> -> vector<8x128xf32>
    %c0_3 = arith.constant 0 : index
    %c0_4 = arith.constant 0 : index
    %3 = vector.load %arg4[%c0_3, %c0_4] : memref<1x128xf32, #tpu.memory_space<vmem>>, vector<1x128xf32>
    %4 = vector.broadcast %3 : vector<1x128xf32> to vector<8x128xf32>
    %5 = arith.addf %2, %4 : vector<8x128xf32>
    %6 = arith.mulf %5, %5 : vector<8x128xf32>
    %7 = arith.mulf %5, %6 : vector<8x128xf32>
    %cst_5 = arith.constant 4.471500e-02 : f32
    %8 = vector.broadcast %cst_5 : f32 to vector<8x128xf32>
    %9 = arith.mulf %8, %7 : vector<8x128xf32>
    %10 = arith.addf %5, %9 : vector<8x128xf32>
    %cst_6 = arith.constant 0.797884583 : f32
    %11 = vector.broadcast %cst_6 : f32 to vector<8x128xf32>
    %12 = arith.mulf %11, %10 : vector<8x128xf32>
    %13 = math.tanh %12 : vector<8x128xf32>
    %cst_7 = arith.constant 1.000000e+00 : f32
    %14 = vector.broadcast %cst_7 : f32 to vector<8x128xf32>
    %15 = arith.addf %14, %13 : vector<8x128xf32>
    %cst_8 = arith.constant 5.000000e-01 : f32
    %16 = vector.broadcast %cst_8 : f32 to vector<8x128xf32>
    %17 = arith.mulf %16, %15 : vector<8x128xf32>
    %18 = arith.mulf %5, %17 : vector<8x128xf32>
    %c0_9 = arith.constant 0 : index
    %c0_10 = arith.constant 0 : index
    %19 = vector.load %arg2[%c0_9, %c0_10] : memref<8x768xbf16, #tpu.memory_space<vmem>>, vector<8x768xbf16>
    %c0_11 = arith.constant 0 : index
    %c0_12 = arith.constant 0 : index
    %20 = vector.load %arg5[%c0_11, %c0_12] : memref<768x128xbf16, #tpu.memory_space<vmem>>, vector<768x128xbf16>
    %cst_13 = arith.constant dense<0.000000e+00> : vector<8x128xf32>
    %21 = tpu.matmul %19, %20, %cst_13 {dimension_numbers = #tpu.dot_dimension_numbers<[1], [0], [0], [1], [0, 0, 1, 1], [], []>} : vector<8x768xbf16>, vector<768x128xbf16>, vector<8x128xf32> -> vector<8x128xf32>
    %c0_14 = arith.constant 0 : index
    %c0_15 = arith.constant 0 : index
    %22 = vector.load %arg6[%c0_14, %c0_15] : memref<1x128xf32, #tpu.memory_space<vmem>>, vector<1x128xf32>
    %23 = vector.broadcast %22 : vector<1x128xf32> to vector<8x128xf32>
    %24 = arith.addf %21, %23 : vector<8x128xf32>
    %cst_16 = arith.constant 0.000000e+00 : f32
    %25 = vector.broadcast %cst_16 : f32 to vector<8x128xf32>
    %26 = arith.maximumf %24, %25 : vector<8x128xf32>
    %27 = tpu.concatenate %18, %26 in 1 : vector<8x128xf32>, vector<8x128xf32> -> vector<8x256xf32>
    %28 = arith.truncf %27 : vector<8x256xf32> to vector<8x256xbf16>
    %c0_17 = arith.constant 0 : index
    %c0_18 = arith.constant 0 : index
    %29 = vector.load %arg7[%c0_17, %c0_18] : memref<256x128xbf16, #tpu.memory_space<vmem>>, vector<256x128xbf16>
    %cst_19 = arith.constant dense<0.000000e+00> : vector<8x128xf32>
    %30 = tpu.matmul %28, %29, %cst_19 {dimension_numbers = #tpu.dot_dimension_numbers<[1], [0], [0], [1], [0, 0, 1, 1], [], []>} : vector<8x256xbf16>, vector<256x128xbf16>, vector<8x128xf32> -> vector<8x128xf32>
    %c0_20 = arith.constant 0 : index
    %c0_21 = arith.constant 0 : index
    %31 = vector.load %arg8[%c0_20, %c0_21] : memref<1x128xf32, #tpu.memory_space<vmem>>, vector<1x128xf32>
    %32 = vector.broadcast %31 : vector<1x128xf32> to vector<8x128xf32>
    %33 = arith.addf %30, %32 : vector<8x128xf32>
    %34 = arith.truncf %33 : vector<8x128xf32> to vector<8x128xbf16>
    %c0_22 = arith.constant 0 : index
    %c0_23 = arith.constant 0 : index
    %35 = vector.load %arg9[%c0_22, %c0_23] : memref<128x128xbf16, #tpu.memory_space<vmem>>, vector<128x128xbf16>
    %cst_24 = arith.constant dense<0.000000e+00> : vector<8x128xf32>
    %36 = tpu.matmul %34, %35, %cst_24 {dimension_numbers = #tpu.dot_dimension_numbers<[1], [0], [0], [1], [0, 0, 1, 1], [], []>} : vector<8x128xbf16>, vector<128x128xbf16>, vector<8x128xf32> -> vector<8x128xf32>
    %c0_25 = arith.constant 0 : index
    %c0_26 = arith.constant 0 : index
    %37 = vector.load %arg10[%c0_25, %c0_26] : memref<1x128xf32, #tpu.memory_space<vmem>>, vector<1x128xf32>
    %38 = vector.broadcast %37 : vector<1x128xf32> to vector<8x128xf32>
    %39 = arith.addf %36, %38 : vector<8x128xf32>
    %c0_27 = arith.constant 0 : index
    %c0_28 = arith.constant 0 : index
    %40 = vector.load %arg11[%c0_27, %c0_28] : memref<8x128xf32, #tpu.memory_space<vmem>>, vector<8x128xf32>
    tpu.vector_store %arg11[%c0_27, %c0_28], %33 {strides = array<i32>} : memref<8x128xf32, #tpu.memory_space<vmem>>, vector<8x128xf32>,
    %c0_29 = arith.constant 0 : index
    %c0_30 = arith.constant 0 : index
    %41 = vector.load %arg12[%c0_29, %c0_30] : memref<8x128xf32, #tpu.memory_space<vmem>>, vector<8x128xf32>
    tpu.vector_store %arg12[%c0_29, %c0_30], %39 {strides = array<i32>} : memref<8x128xf32, #tpu.memory_space<vmem>>, vector<8x128xf32>,
    return
  }
  func.func @transform_0(%arg0: i32) -> (i32, i32) {
    %c0_i32 = arith.constant 0 : i32
    %c0_i32_0 = arith.constant 0 : i32
    return %arg0, %c0_i32 : i32, i32
  }
  func.func @transform_1(%arg0: i32) -> (i32, i32) {
    %c0_i32 = arith.constant 0 : i32
    %c0_i32_0 = arith.constant 0 : i32
    return %arg0, %c0_i32 : i32, i32
  }
  func.func @transform_2(%arg0: i32) -> (i32, i32) {
    %c0_i32 = arith.constant 0 : i32
    %c0_i32_0 = arith.constant 0 : i32
    %c0_i32_1 = arith.constant 0 : i32
    return %c0_i32, %c0_i32_0 : i32, i32
  }
  func.func @transform_3(%arg0: i32) -> (i32, i32) {
    %c0_i32 = arith.constant 0 : i32
    %c0_i32_0 = arith.constant 0 : i32
    %c0_i32_1 = arith.constant 0 : i32
    return %c0_i32, %c0_i32_0 : i32, i32
  }
  func.func @transform_4(%arg0: i32) -> (i32, i32) {
    %c0_i32 = arith.constant 0 : i32
    %c0_i32_0 = arith.constant 0 : i32
    %c0_i32_1 = arith.constant 0 : i32
    return %c0_i32, %c0_i32_0 : i32, i32
  }
  func.func @transform_5(%arg0: i32) -> (i32, i32) {
    %c0_i32 = arith.constant 0 : i32
    %c0_i32_0 = arith.constant 0 : i32
    %c0_i32_1 = arith.constant 0 : i32
    return %c0_i32, %c0_i32_0 : i32, i32
  }
  func.func @transform_6(%arg0: i32) -> (i32, i32) {
    %c0_i32 = arith.constant 0 : i32
    %c0_i32_0 = arith.constant 0 : i32
    %c0_i32_1 = arith.constant 0 : i32
    return %c0_i32, %c0_i32_0 : i32, i32
  }
  func.func @transform_7(%arg0: i32) -> (i32, i32) {
    %c0_i32 = arith.constant 0 : i32
    %c0_i32_0 = arith.constant 0 : i32
    %c0_i32_1 = arith.constant 0 : i32
    return %c0_i32, %c0_i32_0 : i32, i32
  }
  func.func @transform_8(%arg0: i32) -> (i32, i32) {
    %c0_i32 = arith.constant 0 : i32
    %c0_i32_0 = arith.constant 0 : i32
    %c0_i32_1 = arith.constant 0 : i32
    return %c0_i32, %c0_i32_0 : i32, i32
  }
  func.func @transform_9(%arg0: i32) -> (i32, i32) {
    %c0_i32 = arith.constant 0 : i32
    %c0_i32_0 = arith.constant 0 : i32
    %c0_i32_1 = arith.constant 0 : i32
    return %c0_i32, %c0_i32_0 : i32, i32
  }
  func.func @transform_10(%arg0: i32) -> (i32, i32) {
    %c0_i32 = arith.constant 0 : i32
    %c0_i32_0 = arith.constant 0 : i32
    return %arg0, %c0_i32 : i32, i32
  }
  func.func @transform_11(%arg0: i32) -> (i32, i32) {
    %c0_i32 = arith.constant 0 : i32
    %c0_i32_0 = arith.constant 0 : i32
    return %arg0, %c0_i32 : i32, i32
  }
}

</mosaic_0001>

<bundles_post_ra>
// kernel: avclassifier_forward.1
= control target key start
LH: loop header
LB: loop body
LE: loop exit
PB: predicated region body
PF: predicated region fallthrough
CT: control target
= control target key end

     0   :  { %vm1405_vm0 = vmmov 0   ;;  %s1769_s2 = inlined_call_operand.vmem [shape: bf16[256,128], index: 2, kind: input, shape index: {}]   ;;  %s1770_s4 = inlined_call_operand.vmem [shape: bf16[768,128], index: 4, kind: input, shape index: {}]   ;;  %s1771_s0 = inlined_call_operand.vmem [shape: bf16[8,256], index: 0, kind: input, shape index: {}]   ;;  %s1772_s1 = inlined_call_operand.vmem [shape: bf16[8,768], index: 1, kind: input, shape index: {}]   ;;  %s1773_s6 = inlined_call_operand.vmem [shape: bf16[256,128], index: 6, kind: input, shape index: {}]   ;;  %s1774_s8 = inlined_call_operand.vmem [shape: bf16[128,128], index: 8, kind: input, shape index: {}]   ;;  %s1775_s3 = inlined_call_operand.vmem [shape: f32[1,128], index: 3, kind: input, shape index: {}]   ;;  %s1776_s5 = inlined_call_operand.vmem [shape: f32[1,128], index: 5, kind: input, shape index: {}]   ;;  %s1777_s7 = inlined_call_operand.vmem [shape: f32[1,128], index: 7, kind: input, shape index: {}]   ;;  %s1778_s10 = inlined_call_operand.vmem [shape: f32[8,128], index: 10, kind: output, shape index: {0}]   ;;  %s1779_s9 = inlined_call_operand.vmem [shape: f32[1,128], index: 9, kind: input, shape index: {}]   ;;  %s1780_s11 = inlined_call_operand.vmem [shape: f32[8,128], index: 11, kind: output, shape index: {1}]  }
   0x1   :  { %v1306_v0 = vld [vmem:[%s1769_s2 + $0x78] sm:$0xff]   ;;  %v1310_v4 = vld [vmem:[%s1769_s2 + $0x70] sm:$0xff]   ;;  %v1314_v8 = vld [vmem:[%s1769_s2 + $0x68] sm:$0xff]  }
   0x2   :  { %v1307_v1 = vld [vmem:[%s1770_s4 + $0x78] sm:$0xff]   ;;  %1165 = vmatprep.subr.bf16.mxu0 %v1306_v0  ;;  %v1311_v5 = vld [vmem:[%s1770_s4 + $0x70] sm:$0xff]   ;;  %v1315_v9 = vld [vmem:[%s1770_s4 + $0x68] sm:$0xff]  }
   0x3   :  { %v1308_v2 = vld [vmem:[%s1769_s2 + $0x38] sm:$0xff]   ;;  %1187 = vmatprep.subr.bf16.mxu1 %v1307_v1  ;;  %v1312_v6 = vld [vmem:[%s1769_s2 + $0x30] sm:$0xff]   ;;  %v1316_v10 = vld [vmem:[%s1769_s2 + $0x28] sm:$0xff]  }
   0x4   :  { %v1309_v3 = vld [vmem:[%s1770_s4 + $0x38] sm:$0xff]   ;;  %1166 = vmatpush3.bf16.msra.mxu0 %v1308_v2  ;;  %v1313_v7 = vld [vmem:[%s1770_s4 + $0x30] sm:$0xff]   ;;  %v1317_v11 = vld [vmem:[%s1770_s4 + $0x28] sm:$0xff]  }
   0x5   :  { %1188 = vmatpush3.bf16.msra.mxu1 %v1309_v3  ;;  %1167 = vmatprep.subr.bf16.mxu0 %v1310_v4  ;;  %v1318_v12 = vld [vmem:[%s1769_s2 + $0x60] sm:$0xff]   ;;  %v1322_v16 = vld [vmem:[%s1769_s2 + $0x58] sm:$0xff]   ;;  %v1326_v20 = vld [vmem:[%s1769_s2 + $0x50] sm:$0xff]  }
   0x6   :  { %1189 = vmatprep.subr.bf16.mxu1 %v1311_v5  ;;  %v1319_v13 = vld [vmem:[%s1770_s4 + $0x60] sm:$0xff]   ;;  %v1323_v17 = vld [vmem:[%s1770_s4 + $0x58] sm:$0xff]   ;;  %v1327_v21 = vld [vmem:[%s1770_s4 + $0x50] sm:$0xff]  }
   0x7   :  { %v1320_v14 = vld [vmem:[%s1769_s2 + $0x20] sm:$0xff]   ;;  %v1324_v18 = vld [vmem:[%s1769_s2 + $0x18] sm:$0xff]   ;;  %v1328_v22 = vld [vmem:[%s1769_s2 + $0x10] sm:$0xff]  }
   0x8   :  { %1168 = vmatpush3.bf16.msra.mxu0 %v1312_v6  ;;  %v1321_v15 = vld [vmem:[%s1770_s4 + $0x20] sm:$0xff]   ;;  %v1325_v19 = vld [vmem:[%s1770_s4 + $0x18] sm:$0xff]   ;;  %v1329_v23 = vld [vmem:[%s1770_s4 + $0x10] sm:$0xff]  }
   0x9   :  { %1190 = vmatpush3.bf16.msra.mxu1 %v1313_v7  ;;  %1169 = vmatprep.subr.bf16.mxu0 %v1314_v8  ;;  %v1330_v24 = vld [vmem:[%s1769_s2 + $0x48] sm:$0xff]   ;;  %v1334_v28 = vld [vmem:[%s1769_s2 + $0x40] sm:$0xff]   ;;  %v1342_v38 = vld [vmem:[%s1770_s4 + $0xf8] sm:$0xff]  }
   0xa   :  { %1191 = vmatprep.subr.bf16.mxu1 %v1315_v9  ;;  %v1331_v25 = vld [vmem:[%s1770_s4 + $0x48] sm:$0xff]   ;;  %v1335_v29 = vld [vmem:[%s1770_s4 + $0x40] sm:$0xff]   ;;  %v1343_v39 = vld [vmem:[%s1770_s4 + $0x178] sm:$0xff]  }
   0xb   :  { %v1332_v26 = vld [vmem:[%s1769_s2 + $0x8] sm:$0xff]   ;;  %v1336_v30 = vld [vmem:[%s1769_s2] sm:$0xff]   ;;  %v1344_v40 = vld [vmem:[%s1770_s4 + $0xb8] sm:$0xff]  }
   0xc   :  { %1170 = vmatpush3.bf16.msra.mxu0 %v1316_v10  ;;  %v1333_v27 = vld [vmem:[%s1770_s4 + $0x8] sm:$0xff]   ;;  %v1337_v31 = vld [vmem:[%s1770_s4] sm:$0xff]   ;;  %v1345_v41 = vld [vmem:[%s1770_s4 + $0x138] sm:$0xff]  }
   0xd   :  { %1192 = vmatpush3.bf16.msra.mxu1 %v1317_v11  ;;  %1171 = vmatprep.subr.bf16.mxu0 %v1318_v12  ;;  %v38_v32 = vld [vmem:[%s1771_s0] sm:$0xff]  ;;  %v1346_v42 = vld [vmem:[%s1770_s4 + $0xf0] sm:$0xff]   ;;  %v1350_v46 = vld [vmem:[%s1770_s4 + $0xe8] sm:$0xff]  }
   0xe   :  { %1193 = vmatprep.subr.bf16.mxu1 %v1319_v13  ;;  %v230_v33 = vld [vmem:[%s1772_s1] sm:$0xff]  ;;  %v1066_v34 = vcombine.low %v38_v32, %v38_v32  ;;  %v1067_v35 = vcombine.high %v38_v32, %v38_v32  ;;  %v1347_v43 = vld [vmem:[%s1770_s4 + $0x170] sm:$0xff]   ;;  %v1351_v47 = vld [vmem:[%s1770_s4 + $0x168] sm:$0xff]  }
   0xf   :  { %v1085_v36 = vcombine.low %v230_v33, %v230_v33  ;;  %v1086_v37 = vcombine.high %v230_v33, %v230_v33  ;;  %v1348_v44 = vld [vmem:[%s1770_s4 + $0xb0] sm:$0xff]   ;;  %v1352_v48 = vld [vmem:[%s1770_s4 + $0xa8] sm:$0xff]   ;;  %v1354_v50 = vld [vmem:[%s1770_s4 + $0xe0] sm:$0xff]  }
  0x10   :  { %1172 = vmatpush3.bf16.msra.mxu0 %v1320_v14  ;;  %213 = vmatprep.mubr.bf16.mxu0 %v1067_v35  ;;  %v1349_v45 = vld [vmem:[%s1770_s4 + $0x130] sm:$0xff]   ;;  %v1353_v49 = vld [vmem:[%s1770_s4 + $0x128] sm:$0xff]   ;;  %v1355_v51 = vld [vmem:[%s1770_s4 + $0x160] sm:$0xff]  }
  0x11   :  { %1194 = vmatpush3.bf16.msra.mxu1 %v1321_v15  ;;  %1173 = vmatprep.subr.bf16.mxu0 %v1322_v16  ;;  %v1356_v52 = vld [vmem:[%s1770_s4 + $0xa0] sm:$0xff]   ;;  %v1358_v54 = vld [vmem:[%s1770_s4 + $0xd8] sm:$0xff]   ;;  %v1362_v58 = vld [vmem:[%s1770_s4 + $0xd0] sm:$0xff]  }
  0x12   :  { %1195 = vmatprep.subr.bf16.mxu1 %v1323_v17  ;;  %677 = vmatprep.mubr.bf16.mxu1 %v1086_v37  ;;  %v1357_v53 = vld [vmem:[%s1770_s4 + $0x120] sm:$0xff]   ;;  %v1359_v55 = vld [vmem:[%s1770_s4 + $0x158] sm:$0xff]   ;;  %v1363_v59 = vld [vmem:[%s1770_s4 + $0x150] sm:$0xff]  }
  0x13   :  { %v1360_v56 = vld [vmem:[%s1770_s4 + $0x98] sm:$0xff]   ;;  %v1364_v60 = vld [vmem:[%s1770_s4 + $0x90] sm:$0xff]   ;;  %v1366_v62 = vld [vmem:[%s1770_s4 + $0xc8] sm:$0xff]  }
  0x14   :  { %1174 = vmatpush3.bf16.msra.mxu0 %v1324_v18  ;;  %v1361_v57 = vld [vmem:[%s1770_s4 + $0x118] sm:$0xff]   ;;  %v1365_v61 = vld [vmem:[%s1770_s4 + $0x110] sm:$0xff]   ;;  %v1367_v63 = vld [vmem:[%s1770_s4 + $0x148] sm:$0xff]  }
  0x15   :  { %1196 = vmatpush3.bf16.msra.mxu1 %v1325_v19  ;;  %1175 = vmatprep.subr.bf16.mxu0 %v1326_v20  ;;  %v1368_v0 = vld [vmem:[%s1770_s4 + $0x88] sm:$0xff]   ;;  %v1370_v2 = vld [vmem:[%s1770_s4 + $0xc0] sm:$0xff]   ;;  %v232_v9 = vld [vmem:[%s1772_s1 + $0x10] sm:$0xff] }
  0x16   :  { %1197 = vmatprep.subr.bf16.mxu1 %v1327_v21  ;;  %v1369_v1 = vld [vmem:[%s1770_s4 + $0x108] sm:$0xff]   ;;  %v1371_v3 = vld [vmem:[%s1770_s4 + $0x140] sm:$0xff]   ;;  %v1089_v10 = vcombine.low %v232_v9, %v232_v9  ;;  %v1090_v11 = vcombine.high %v232_v9, %v232_v9  ;;  %v1378_v12 = vld [vmem:[%s1773_s6 + $0x78] sm:$0xff]  }
  0x17   :  { %v1372_v4 = vld [vmem:[%s1770_s4 + $0x80] sm:$0xff]   ;;  %v231_v6 = vld [vmem:[%s1772_s1 + $0x8] sm:$0xff]  ;;  %v1379_v13 = vld [vmem:[%s1773_s6 + $0x38] sm:$0xff]  }
  0x18   :  { %1176 = vmatpush3.bf16.msra.mxu0 %v1328_v22  ;;  %v1373_v5 = vld [vmem:[%s1770_s4 + $0x100] sm:$0xff]   ;;  %v1087_v7 = vcombine.low %v231_v6, %v231_v6  ;;  %v1088_v8 = vcombine.high %v231_v6, %v231_v6  ;;  %v1380_v14 = vld [vmem:[%s1773_s6 + $0x70] sm:$0xff]   ;;  %v1382_v16 = vld [vmem:[%s1773_s6 + $0x68] sm:$0xff]  }
  0x19   :  { %1198 = vmatpush3.bf16.msra.mxu1 %v1329_v23  ;;  %1177 = vmatprep.subr.bf16.mxu0 %v1330_v24  ;;  %v1381_v15 = vld [vmem:[%s1773_s6 + $0x30] sm:$0xff]   ;;  %v1383_v17 = vld [vmem:[%s1773_s6 + $0x28] sm:$0xff]   ;;  %v1384_v18 = vld [vmem:[%s1773_s6 + $0x60] sm:$0xff]  }
  0x1a   :  { %1199 = vmatprep.subr.bf16.mxu1 %v1331_v25  ;;  %v1385_v19 = vld [vmem:[%s1773_s6 + $0x20] sm:$0xff]   ;;  %v1386_v20 = vld [vmem:[%s1773_s6 + $0x58] sm:$0xff]   ;;  %v1388_v22 = vld [vmem:[%s1773_s6 + $0x50] sm:$0xff]  }
  0x1b   :  { %v1387_v21 = vld [vmem:[%s1773_s6 + $0x18] sm:$0xff]   ;;  %v1389_v23 = vld [vmem:[%s1773_s6 + $0x10] sm:$0xff]   ;;  %v1390_v24 = vld [vmem:[%s1773_s6 + $0x48] sm:$0xff]  }
  0x1c   :  { %1178 = vmatpush3.bf16.msra.mxu0 %v1332_v26  ;;  %v1391_v25 = vld [vmem:[%s1773_s6 + $0x8] sm:$0xff]   ;;  %v1392_v26 = vld [vmem:[%s1773_s6 + $0x40] sm:$0xff]   ;;  %v1398_v33 = vld [vmem:[%s1774_s8 + $0x18] sm:$0xff]  }
  0x1d   :  { %1200 = vmatpush3.bf16.msra.mxu1 %v1333_v27  ;;  %1179 = vmatprep.subr.bf16.mxu0 %v1334_v28  ;;  %v1393_v27 = vld [vmem:[%s1773_s6] sm:$0xff]   ;;  %v1404_v28 = vmov 0.0   ;;  %v1400_v9 = vld [vmem:[%s1774_s8 + $0x8] sm:$0xff]  }
  0x1e   :  { %1201 = vmatprep.subr.bf16.mxu1 %v1335_v29  ;;  %v1394_v29 = vld [vmem:[%s1774_s8 + $0x38] sm:$0xff]   ;;  %v1397_v32 = vld [vmem:[%s1774_s8 + $0x20] sm:$0xff]  }
  0x1f   :  { %v1065_v37 = vld [vmem:[%s1775_s3] ss:$0 sm:$0xff] }
  0x20   :  { %1180 = vmatpush3.bf16.msra.mxu0 %v1336_v30  ;;  %v1395_v30 = vld [vmem:[%s1774_s8 + $0x30] sm:$0xff]  }
  0x21   :  { %1202 = vmatpush3.bf16.msra.mxu1 %v1337_v31  ;;  %1209 = vmatprep.subr.bf16.mxu0 %v1342_v38  ;;  %v1396_v31 = vld [vmem:[%s1774_s8 + $0x28] sm:$0xff]  }
  0x22   :  { %1231 = vmatprep.subr.bf16.mxu1 %v1343_v39 }
  0x23   :  { %214 = vmatmul.mubr.bf16.vlgmr.msra.gmra.mxu0 %v1066_v34  ;;  %v1399_v34 = vld [vmem:[%s1774_s8 + $0x10] sm:$0xff]  }
  0x24   :  { %678 = vmatmul.mubr.bf16.vlgmr.msra.gmra.mxu1 %v1085_v36  ;;  %1210 = vmatpush3.bf16.msra.mxu0 %v1344_v40 }
  0x25   :  { %1232 = vmatpush3.bf16.msra.mxu1 %v1345_v41  ;;  %1211 = vmatprep.subr.bf16.mxu0 %v1346_v42 }
  0x26   :  { %1233 = vmatprep.subr.bf16.mxu1 %v1347_v43  ;;  %717 = vmatprep.mubr.bf16.mxu0 %v1088_v8 }
  0x27   :  { %757 = vmatprep.mubr.bf16.mxu1 %v1090_v11 }
  0x28   :  { %1212 = vmatpush3.bf16.msra.mxu0 %v1348_v44 }
  0x29   :  { %1234 = vmatpush3.bf16.msra.mxu1 %v1349_v45  ;;  %1213 = vmatprep.subr.bf16.mxu0 %v1350_v46 }
  0x2a   :  { %1235 = vmatprep.subr.bf16.mxu1 %v1351_v47 }
  0x2c   :  { %1214 = vmatpush3.bf16.msra.mxu0 %v1352_v48 }
  0x2d   :  { %1236 = vmatpush3.bf16.msra.mxu1 %v1353_v49  ;;  %1215 = vmatprep.subr.bf16.mxu0 %v1354_v50 }
  0x2e   :  { %1237 = vmatprep.subr.bf16.mxu1 %v1355_v51 }
  0x30   :  { %1216 = vmatpush3.bf16.msra.mxu0 %v1356_v52 }
  0x31   :  { %1238 = vmatpush3.bf16.msra.mxu1 %v1357_v53  ;;  %1217 = vmatprep.subr.bf16.mxu0 %v1358_v54  ;;  %v1084_v53 = vld [vmem:[%s1776_s5] ss:$0 sm:$0xff] }
  0x32   :  { %1239 = vmatprep.subr.bf16.mxu1 %v1359_v55 }
  0x34   :  { %1218 = vmatpush3.bf16.msra.mxu0 %v1360_v56 }
  0x35   :  { %1240 = vmatpush3.bf16.msra.mxu1 %v1361_v57  ;;  %1219 = vmatprep.subr.bf16.mxu0 %v1362_v58 }
  0x36   :  { %1241 = vmatprep.subr.bf16.mxu1 %v1363_v59 }
  0x38   :  { %1220 = vmatpush3.bf16.msra.mxu0 %v1364_v60 }
  0x39   :  { %1242 = vmatpush3.bf16.msra.mxu1 %v1365_v61  ;;  %1221 = vmatprep.subr.bf16.mxu0 %v1366_v62 }
  0x3a   :  { %1243 = vmatprep.subr.bf16.mxu1 %v1367_v63 }
  0x3c   :  { %1222 = vmatpush3.bf16.msra.mxu0 %v1368_v0 }
  0x3d   :  { %1244 = vmatpush3.bf16.msra.mxu1 %v1369_v1  ;;  %1223 = vmatprep.subr.bf16.mxu0 %v1370_v2 }
  0x3e   :  { %1245 = vmatprep.subr.bf16.mxu1 %v1371_v3 }
  0x40   :  { %1224 = vmatpush3.bf16.msra.mxu0 %v1372_v4 }
  0x41   :  { %1246 = vmatpush3.bf16.msra.mxu1 %v1373_v5  ;;  %1253 = vmatprep.subr.bf16.mxu0 %v1378_v12  ;;  %v1139_v12 = vld [vmem:[%s1777_s7] ss:$0 sm:$0xff] }
  0x42   :  { %1284 = vmatprep.subr.bf16.mxu1 %v1404_v28 }
  0x43   :  { %718 = vmatmul.mubr.bf16.vlgmr.msra.gmra.mxu0 %v1087_v7 }
  0x44   :  { %758 = vmatmul.mubr.bf16.vlgmr.msra.gmra.mxu1 %v1089_v10  ;;  %1254 = vmatpush3.bf16.msra.mxu0 %v1379_v13  ;;  %v1401_v10 = vld [vmem:[%s1774_s8] sm:$0xff]  }
  0x45   :  { %1255 = vmatprep.subr.bf16.mxu0 %v1380_v14  ;;  %1285 = vmatpush3.bf16.msra.mxu1 %v1394_v29 }
  0x46   :  { %1286 = vmatprep.subr.bf16.mxu1 %v1404_v28  ;;  %1300 = vmatprep.mubr.msk.bf16.mxu1 %vm1405_vm0, %v1404_v28 }
  0x48   :  { %1256 = vmatpush3.bf16.msra.mxu0 %v1381_v15 }
  0x49   :  { %1257 = vmatprep.subr.bf16.mxu0 %v1382_v16  ;;  %1287 = vmatpush3.bf16.msra.mxu1 %v1395_v30 }
  0x4a   :  { %1288 = vmatprep.subr.bf16.mxu1 %v1404_v28 }
  0x4c   :  { %1258 = vmatpush3.bf16.msra.mxu0 %v1383_v17 }
  0x4d   :  { %1259 = vmatprep.subr.bf16.mxu0 %v1384_v18  ;;  %1289 = vmatpush3.bf16.msra.mxu1 %v1396_v31 }
  0x4e   :  { %1290 = vmatprep.subr.bf16.mxu1 %v1404_v28 }
  0x50   :  { %1260 = vmatpush3.bf16.msra.mxu0 %v1385_v19  ;;  %v1156_v19 = vld [vmem:[%s1779_s9] ss:$0 sm:$0xff] }
  0x51   :  { %1261 = vmatprep.subr.bf16.mxu0 %v1386_v20  ;;  %1291 = vmatpush3.bf16.msra.mxu1 %v1397_v32 }
  0x52   :  { %1292 = vmatprep.subr.bf16.mxu1 %v1404_v28 }
  0x54   :  { %1262 = vmatpush3.bf16.msra.mxu0 %v1387_v21 }
  0x55   :  { %1263 = vmatprep.subr.bf16.mxu0 %v1388_v22  ;;  %1293 = vmatpush3.bf16.msra.mxu1 %v1398_v33 }
  0x56   :  { %1294 = vmatprep.subr.bf16.mxu1 %v1404_v28 }
  0x58   :  { %1264 = vmatpush3.bf16.msra.mxu0 %v1389_v23 }
  0x59   :  { %1265 = vmatprep.subr.bf16.mxu0 %v1390_v24  ;;  %1295 = vmatpush3.bf16.msra.mxu1 %v1399_v34 }
  0x5a   :  { %1296 = vmatprep.subr.bf16.mxu1 %v1404_v28 }
  0x5c   :  { %1266 = vmatpush3.bf16.msra.mxu0 %v1391_v25 }
  0x5d   :  { %1267 = vmatprep.subr.bf16.mxu0 %v1392_v26  ;;  %1297 = vmatpush3.bf16.msra.mxu1 %v1400_v9 }
  0x5e   :  { %1298 = vmatprep.subr.bf16.mxu1 %v1404_v28 }
  0x60   :  { %1268 = vmatpush3.bf16.msra.mxu0 %v1393_v27 }
  0x61   :  { %1299 = vmatpush3.bf16.msra.mxu1 %v1401_v10 }
  0xe3   :  { %v1181_v35 = vpop.f32.mrf.mxu0 }
  0xe4   :  { %v1203_v36 = vpop.f32.mrf.mxu1 }
  0xe5   :  { %v1182_v38 = vpop.f32.mrf.mxu0 }
  0xe6   :  { %v1204_v39 = vpop.f32.mrf.mxu1  ;;  %v1183_v40 = vadd.f32 %v1182_v38, %v1181_v35 }
  0xe7   :  { %v1184_v41 = vpop.f32.mrf.mxu0  ;;  %v1205_v52 = vadd.f32 %v1204_v39, %v1203_v36 }
  0xe8   :  { %v1206_v42 = vpop.f32.mrf.mxu1  ;;  %v216_v43 = vadd.f32 %v1183_v40, %v1065_v37 }
  0xe9   :  { %v1185_v44 = vpop.f32.mrf.mxu0  ;;  %v680_v59 = vadd.f32 %v1205_v52, %v1084_v53 }
  0xea   :  { %v1207_v45 = vpop.f32.mrf.mxu1  ;;  %v221_v46 = vmul.f32 %v216_v43, %v216_v43 }
  0xec   :  { %v222_v47 = vmul.f32 %v221_v46, %v216_v43 }
  0xee   :  { %v223_v48 = vmul.f32 0.044715, %v222_v47 }
  0xf0   :  { %v224_v49 = vadd.f32 %v223_v48, %v216_v43 }
  0xf2   :  { %v225_v50 = vmul.f32 0.7978846, %v224_v49 }
  0xf4   :  { %1402 = vtanh.f32 %v225_v50 }
 0x101   :  { %v1403_v51 = vpop.eup %1402 }
 0x102   :  { %v227_v56 = vadd.f32 1.0, %v1403_v51 }
 0x103   :  { %v1225_v54 = vpop.f32.mrf.mxu0 }
 0x104   :  { %v1247_v55 = vpop.f32.mrf.mxu1  ;;  %v228_v63 = vmul.f32 0.5, %v227_v56 }
 0x105   :  { %v1226_v57 = vpop.f32.mrf.mxu0 }
 0x106   :  { %v1248_v58 = vpop.f32.mrf.mxu1  ;;  %v1227_v60 = vadd.f32 %v1226_v57, %v1225_v54  ;;  %v229_v5 = vmul.f32 %v228_v63, %v216_v43 }
 0x107   :  { %v1228_v61 = vpop.f32.mrf.mxu0  ;;  %v1249_v1 = vadd.f32 %v1248_v58, %v1247_v55 }
 0x108   :  { %v1250_v62 = vpop.f32.mrf.mxu1  ;;  %v720_v0 = vadd.f32 %v1227_v60, %v680_v59  ;;  %v766_v8 = vpack.c.bf16 %v229_v5, %v229_v5 }
 0x109   :  { %v1229_v2 = vpop.f32.mrf.mxu0 }
 0x10a   :  { %v1251_v3 = vpop.f32.mrf.mxu1  ;;  %v760_v4 = vadd.f32 %v1249_v1, %v720_v0 }
 0x10c   :  { %v765_v6 = vmax.f32 %v760_v4, 0.0 }
 0x10e   :  { %v767_v7 = vpack.c.bf16 %v765_v6, %v765_v6 }
 0x110   :  { %935 = vmatprep.mubr.bf16.mxu0 %v767_v7 }
 0x111   :  { %936 = vmatmul.mubr.bf16.vlgmr.msra.gmra.mxu0 %v766_v8 }
 0x1d1   :  { %v1269_v11 = vpop.f32.mrf.mxu0 }
 0x1d3   :  { %v1270_v13 = vpop.f32.mrf.mxu0 }
 0x1d4   :  { %v1271_v14 = vadd.f32 %v1270_v13, %v1269_v11 }
 0x1d5   :  { %v1272_v15 = vpop.f32.mrf.mxu0 }
 0x1d6   :  { %v938_v16 = vadd.f32 %v1271_v14, %v1139_v12 }
 0x1d7   :  { %v1273_v17 = vpop.f32.mrf.mxu0 }
 0x1d8   :  { %v943_v18 = vpack.c.bf16 %v938_v16, %v938_v16  ;;  %1055 = vst [vmem:[%s1778_s10] sm:$0xff] %v938_v16 }
 0x1da   :  { %1301 = vmatmul.mubr.bf16.vlgmr.msra.gmra.mxu1 %v943_v18 }
 0x29a   :  { %v1049_v20 = vpop.f32.mrf.mxu1 }
 0x29b   :  { %v1050_v21 = vadd.f32 %v1156_v19, %v1049_v20 }
 0x29c   :  { %v1302_v22 = vpop.f32.mrf.mxu1 }
 0x29d   :  { %1056 = vst [vmem:[%s1780_s11] sm:$0xff] %v1050_v21 }
 0x29e   :  { %v1052_v23 = vpop.f32.mrf.mxu1 }
 0x2a0   :  { %v1303_v24 = vpop.f32.mrf.mxu1 }

</bundles_post_ra>
